<compile_context>
chip_gen: v6e
topology: v6e:2x2x1
jax: 0.10.0
libtpu: 0.0.40
codegen_flags: <defaults>
</compile_context>

<pallas_src>
import math
import numpy as np
import jax
import jax.numpy as jnp
from jax.experimental import pallas as pl
from jax.experimental.pallas import tpu as pltpu


# ----------------------------------------------------------------------------
# In-kernel helpers
# ----------------------------------------------------------------------------
def _gelu_exact(y):
    # nn.GELU default ('none' approximation) -> exact erf-based GELU.
    # TODO(synk): switch to tanh GELU (EUP slot) only if profiling shows VALU-bound.
    return 0.5 * y * (1.0 + jax.lax.erf(y * (1.0 / math.sqrt(2.0))))


def _layernorm(y, g, b, eps=1e-6):
    # LayerNorm3d: biased variance over the channel (last) dim, like PyTorch (eps=1e-6).
    mu = jnp.mean(y, axis=-1, keepdims=True)
    var = jnp.mean((y - mu) * (y - mu), axis=-1, keepdims=True)
    return g * ((y - mu) * jax.lax.rsqrt(var + eps)) + b


# ----------------------------------------------------------------------------
# Pallas kernels
# ----------------------------------------------------------------------------
def _sparse_pe_kernel(pts_ref, gauss_ref, table_ref, out_ref):
    """Random-Fourier PE + label/corner embedding add for points AND boxes.

    pts   : (M, 8)  rows = [x, y, z, label, 0, 0, 0, 0], coords normalized to [0,1]
    gauss : (3, F)  gaussian projection
    table : (5, E)  rows: [not_a_point, pt_label0, pt_label1, box_c0, box_c1]
    out   : (M, E)  with E = 2F
    """
    pts = pts_ref[...]                                    # (M, 8)
    c = 2.0 * pts[:, 0:3] - 1.0                           # (M, 3)
    g = gauss_ref[...]                                    # (3, F)
    # (M,3) @ (3,F) with tiny K -> broadcast VPU MACs (skip a K=3 MXU issue).
    proj = (c[:, 0:1] * g[0:1, :]
            + c[:, 1:2] * g[1:2, :]
            + c[:, 2:3] * g[2:3, :])                      # (M, F)
    ang = (2.0 * math.pi) * proj

    lab = pts[:, 3:4]                                     # (M, 1)
    table = table_ref[...]                                # (5, E)
    sel = lambda v: jnp.where(lab == v, 1.0, 0.0)         # (M, 1) one-hot masks
    add = (sel(-1.0) * table[0:1, :]                      # not-a-point embed
           + sel(0.0) * table[1:2, :]                     # point label 0
           + sel(1.0) * table[2:3, :]                     # point label 1
           + sel(2.0) * table[3:4, :]                     # box corner 0
           + sel(3.0) * table[4:5, :])                    # box corner 1
    keep = 1.0 - sel(-1.0)                                # zero PE where label==-1

    F = g.shape[1]
    out_ref[:, 0:F] = keep * jnp.sin(ang) + add[:, 0:F]
    out_ref[:, F:] = keep * jnp.cos(ang) + add[:, F:]


def _mask_fused_kernel(x_ref, w1_ref, w2_ref, w3_ref, avg_ref, vecs_ref, out_ref):
    """Fused Conv3d+LN+GELU -> Conv3d+LN+GELU -> Conv3d(1x1x1) for one batch element.

    x    : (S, 64*Cin)     bf16  composite 4x4x4 im2col per conv2 output cell
    w1   : (64*Cin, 8*C4)  bf16  block-diagonal conv1 weight (all 8 sub-offsets)
    w2   : (8*C4, C2)      bf16  conv2 weight, lane-packed to match conv1 output
    w3   : (C2, E)         bf16  conv3 (1x1x1) weight
    avg  : (8*C4, 8*C4)    f32   per-C4-group averaging matrix (grouped LayerNorm)
    vecs : (8, P)          f32   packed rows [b1p, g1p, be1p, b2, g2, be2, b3, 0]
    out  : (S, E)          f32
    """
    c4p = w2_ref.shape[0]          # 8*C4
    c2 = w2_ref.shape[1]
    e = w3_ref.shape[1]

    vecs = vecs_ref[...]
    b1 = vecs[0:1, :c4p]
    g1 = vecs[1:2, :c4p]
    be1 = vecs[2:3, :c4p]
    b2 = vecs[3:4, :c2]
    g2 = vecs[4:5, :c2]
    be2 = vecs[5:6, :c2]
    b3 = vecs[6:7, :e]

    # conv1 for all 8 conv2-kernel offsets in ONE bf16 MXU matmul (f32 accumulate).
    a = jnp.dot(x_ref[...], w1_ref[...],
                preferred_element_type=jnp.float32) + b1              # (S, 8*C4)

    # Grouped LayerNorm3d over each C4-lane group via block-averaging matmuls
    # (biased variance, matching PyTorch); no cross-lane reduces needed.
    avg = avg_ref[...]
    mu = jnp.dot(a, avg, preferred_element_type=jnp.float32)
    d = a - mu
    var = jnp.dot(d * d, avg, preferred_element_type=jnp.float32)
    a = _gelu_exact(g1 * (d * jax.lax.rsqrt(var + 1e-6)) + be1)       # (S, 8*C4)

    # conv2 (k=2,s=2) as ONE (S, 8*C4) @ (8*C4, C2) bf16 matmul.
    y2 = jnp.dot(a.astype(jnp.bfloat16), w2_ref[...],
                 preferred_element_type=jnp.float32) + b2             # (S, C2)
    y2 = _gelu_exact(_layernorm(y2, g2, be2))

    # conv3 (1x1x1) == plain matmul + bias.
    out_ref[...] = jnp.dot(y2.astype(jnp.bfloat16), w3_ref[...],
                           preferred_element_type=jnp.float32) + b3   # (S, E)


# ----------------------------------------------------------------------------
# Wrappers / glue
# ----------------------------------------------------------------------------
_VMEM = pl.BlockSpec(memory_space=pltpu.MemorySpace.VMEM)


def _linear_interp_matrix(out_size, in_size):
    """1-D linear interpolation matrix matching PyTorch Upsample(align_corners=False)."""
    Wm = np.zeros((out_size, in_size), dtype=np.float32)
    if in_size == 1:
        Wm[:, 0] = 1.0
        return Wm
    scale = in_size / out_size
    for o in range(out_size):
        src = max((o + 0.5) * scale - 0.5, 0.0)
        i0 = min(int(np.floor(src)), in_size - 1)
        i1 = min(i0 + 1, in_size - 1)
        lam = src - i0
        Wm[o, i0] += 1.0 - lam
        Wm[o, i1] += lam
    return Wm


def _embed_masks(params, cfg, masks):
    E = cfg["embed_dim"]
    Dt, Ht, Wt = cfg["image_embedding_size"]
    B, Cin, D0, H0, W0 = masks.shape
    Ds, Hs, Ws = D0 // 4, H0 // 4, W0 // 4
    S = Ds * Hs * Ws
    K1 = 8 * Cin                      # conv1 im2col patch size
    K8 = 8 * K1                       # composite 4x4x4 patch size
    C4 = params["conv1_w"].shape[0]
    C2 = params["conv2_w"].shape[0]
    C4p = 8 * C4

    # Single layout pass: NCDHW -> (B, S, 64*Cin) composite im2col; lane order is
    # (kd2, kh2, kw2) conv2-offset major, then (kd1, kh1, kw1, Cin) conv1 patch.
    x = masks.astype(jnp.bfloat16).transpose(0, 2, 3, 4, 1)          # channels-last
    x = x.reshape(B, Ds, 2, 2, Hs, 2, 2, Ws, 2, 2, Cin)
    # dims: (b, ds, kd2, kd1, hs, kh2, kh1, ws, kw2, kw1, c)
    x = x.transpose(0, 1, 4, 7, 2, 5, 8, 3, 6, 9, 10)
    x = x.reshape(B, S, K8)

    # conv1 weight in patch order, expanded block-diagonally so one matmul produces
    # the lane-packed (S, 8*C4) activations for all 8 conv2-kernel offsets.
    w1m = params["conv1_w"].transpose(2, 3, 4, 1, 0).reshape(K1, C4)
    w1bd = jnp.kron(jnp.eye(8, dtype=jnp.float32), w1m).astype(jnp.bfloat16)  # (K8, 8*C4)
    # conv2 weight lane-packed to match, conv3 as plain (C2, E).
    w2m = params["conv2_w"].transpose(2, 3, 4, 1, 0).reshape(C4p, C2).astype(jnp.bfloat16)
    w3m = params["conv3_w"].reshape(E, C2).T.astype(jnp.bfloat16)

    # Per-C4-group averaging matrix for the grouped LayerNorm3d(C4).
    avg = jnp.asarray(np.kron(np.eye(8, dtype=np.float32),
                              np.full((C4, C4), 1.0 / C4, np.float32)))

    # Pack the seven bias/LN row vectors into one (8, P) array (one DMA).
    P = max(C4p, C2, E)
    def _row(v):
        v = jnp.asarray(v, jnp.float32).reshape(-1)
        return jnp.pad(v, (0, P - v.shape[0]))
    vecs = jnp.stack([
        _row(jnp.tile(params["conv1_b"], 8)),
        _row(jnp.tile(params["ln1_g"], 8)),
        _row(jnp.tile(params["ln1_b"], 8)),
        _row(params["conv2_b"]),
        _row(params["ln2_g"]),
        _row(params["ln2_b"]),
        _row(params["conv3_b"]),
        jnp.zeros((P,), jnp.float32),
    ])                                                                # (8, P)

    const2 = lambda b: (0, 0)
    y3 = pl.pallas_call(
        _mask_fused_kernel,
        out_shape=jax.ShapeDtypeStruct((B, S, E), jnp.float32),
        grid=(B,),
        in_specs=[
            pl.BlockSpec((None, S, K8), lambda b: (b, 0, 0)),
            pl.BlockSpec((K8, C4p), const2),
            pl.BlockSpec((C4p, C2), const2),
            pl.BlockSpec((C2, E), const2),
            pl.BlockSpec((C4p, C4p), const2),
            pl.BlockSpec((8, P), const2),
        ],
        out_specs=pl.BlockSpec((None, S, E), lambda b: (b, 0, 0)),
        compiler_params=pltpu.CompilerParams(dimension_semantics=("parallel",)),
    )(x, w1bd, w2m, w3m, avg, vecs)

    # Trilinear Upsample(align_corners=False) as separable per-axis interpolation
    # (tiny XLA einsums on the small y3 tensor; avoids the quadratic dense kron).
    Wd = jnp.asarray(_linear_interp_matrix(Dt, Ds))
    Wh = jnp.asarray(_linear_interp_matrix(Ht, Hs))
    Ww = jnp.asarray(_linear_interp_matrix(Wt, Ws))
    y = y3.reshape(B, Ds, Hs, Ws, E)
    y = jnp.einsum('td,bdhwe->bthwe', Wd, y)
    y = jnp.einsum('uh,bthwe->btuwe', Wh, y)
    y = jnp.einsum('vw,btuwe->btuve', Ww, y)
    return y.transpose(0, 4, 1, 2, 3)                                 # (B, E, Dt, Ht, Wt)


def prompt_encoder_forward(params, cfg, points=None, boxes=None, masks=None):
    E = cfg["embed_dim"]
    D_i, H_i, W_i = cfg["input_image_size"]
    ied = cfg["image_embedding_size"]
    norm = jnp.array([W_i, H_i, D_i], jnp.float32)               # coords are (x, y, z)

    if points is not None:
        bs = points[0].shape[0]
    elif boxes is not None:
        bs = boxes.shape[0]
    elif masks is not None:
        bs = masks.shape[0]
    else:
        bs = 1

    # ---------------- sparse path: one fused PE call for points + boxes ------
    coords_list, labels_list = [], []
    n_pts = 0
    if points is not None:
        coords, labels = points
        coords = coords.astype(jnp.float32) + 0.5
        labels = labels.astype(jnp.float32)
        if boxes is None:  # pad with a "not a point" entry
            coords = jnp.concatenate(
                [coords, jnp.zeros((bs, 1, 3), jnp.float32)], axis=1)
            labels = jnp.concatenate(
                [labels, -jnp.ones((bs, 1), jnp.float32)], axis=1)
        n_pts = coords.shape[1]
        coords_list.append(coords.reshape(-1, 3) / norm)
        labels_list.append(labels.reshape(-1, 1))
    if boxes is not None:
        bc = (boxes.astype(jnp.float32) + 0.5).reshape(-1, 3) / norm   # (bs*2, 3)
        coords_list.append(bc)
        labels_list.append(jnp.tile(jnp.array([[2.0], [3.0]], jnp.float32), (bs, 1)))

    if coords_list:
        coords_all = jnp.concatenate(coords_list, axis=0)
        labels_all = jnp.concatenate(labels_list, axis=0)
        M = coords_all.shape[0]
        M_pad = ((M + 7) // 8) * 8
        # Pack coords + labels into a single (M_pad, 8) array; padded rows are
        # "not a point" (label -1) and get sliced off below.
        pts = jnp.concatenate(
            [coords_all, labels_all, jnp.zeros((M, 4), jnp.float32)], axis=1)
        if M_pad != M:
            pad_rows = jnp.zeros((M_pad - M, 8), jnp.float32).at[:, 3].set(-1.0)
            pts = jnp.concatenate([pts, pad_rows], axis=0)
        table = jnp.concatenate(
            [params["not_a_point"][None, :], params["point_embeds"]], axis=0)  # (5, E)
        pe = pl.pallas_call(
            _sparse_pe_kernel,
            out_shape=jax.ShapeDtypeStruct((M_pad, E), jnp.float32),
            in_specs=[_VMEM, _VMEM, _VMEM],
            out_specs=_VMEM,
        )(pts, params["pe_gauss"], table)
        pe = pe[:M]
        chunks = []
        if points is not None:
            chunks.append(pe[: bs * n_pts].reshape(bs, n_pts, E))
        if boxes is not None:
            chunks.append(pe[bs * n_pts:].reshape(bs, 2, E))
        sparse = jnp.concatenate(chunks, axis=1)
    else:
        sparse = jnp.zeros((bs, 0, E), jnp.float32)

    # ---------------- dense path ---------------------------------------------
    if masks is not None:
        dense = _embed_masks(params, cfg, masks)
    else:
        dense = jnp.broadcast_to(params["no_mask"].reshape(1, E, 1, 1, 1),
                                 (bs, E, ied[0], ied[1], ied[2]))
    return sparse, dense


# ----------------------------------------------------------------------------
# Main
# ----------------------------------------------------------------------------
if __name__ == "__main__":
    embed_dim = 32
    image_embedding_size = (2, 4, 4)        # (D, H, W)
    input_image_size = (8, 16, 16)          # (D, H, W)
    mask_in_chans = 16
    C4 = mask_in_chans // 4
    F = embed_dim // 2
    cfg = dict(embed_dim=embed_dim,
               image_embedding_size=image_embedding_size,
               input_image_size=input_image_size)

    key = jax.random.PRNGKey(0)
    ks = jax.random.split(key, 13)
    params = {
        "pe_gauss": jax.random.normal(ks[0], (3, F), jnp.float32),      # scale=1.0
        "point_embeds": jax.random.normal(ks[1], (4, embed_dim), jnp.float32),
        "not_a_point": jax.random.normal(ks[2], (embed_dim,), jnp.float32),
        "no_mask": jax.random.normal(ks[3], (embed_dim,), jnp.float32),
        "conv1_w": 0.1 * jax.random.normal(ks[4], (C4, 20, 2, 2, 2), jnp.float32),
        "conv1_b": 0.1 * jax.random.normal(ks[5], (C4,), jnp.float32),
        "ln1_g": jnp.ones((C4,), jnp.float32),
        "ln1_b": jnp.zeros((C4,), jnp.float32),
        "conv2_w": 0.1 * jax.random.normal(ks[6], (mask_in_chans, C4, 2, 2, 2), jnp.float32),
        "conv2_b": 0.1 * jax.random.normal(ks[7], (mask_in_chans,), jnp.float32),
        "ln2_g": jnp.ones((mask_in_chans,), jnp.float32),
        "ln2_b": jnp.zeros((mask_in_chans,), jnp.float32),
        "conv3_w": 0.1 * jax.random.normal(ks[8], (embed_dim, mask_in_chans, 1, 1, 1), jnp.float32),
        "conv3_b": 0.1 * jax.random.normal(ks[9], (embed_dim,), jnp.float32),
    }

    B, Np = 2, 3
    D_i, H_i, W_i = input_image_size
    pts = jax.random.uniform(ks[10], (B, Np, 3), jnp.float32) * jnp.array(
        [W_i, H_i, D_i], jnp.float32)
    labels = jnp.array([[1, 0, -1], [0, 1, 1]], jnp.int32)
    boxes = jax.random.uniform(ks[11], (B, 6), jnp.float32) * jnp.array(
        [W_i, H_i, D_i, W_i, H_i, D_i], jnp.float32)
    mask_input_size = tuple(4 * s for s in image_embedding_size)        # (8, 16, 16)
    masks = jax.random.normal(ks[12], (B, 20) + mask_input_size, jnp.float32)

    sparse, dense = prompt_encoder_forward(
        params, cfg, points=(pts, labels), boxes=boxes, masks=masks)
    jax.block_until_ready((sparse, dense))

    assert sparse.shape == (B, Np + 2, embed_dim), sparse.shape
    assert dense.shape == (B, embed_dim) + image_embedding_size, dense.shape
    print("KERNEL_OK")
</pallas_src>

<mosaic_0001>
module attributes {stable_mosaic.version = 11 : i64} {
  func.func @_sparse_pe_kernel(%arg0: memref<16x8xf32, #tpu.memory_space<vmem>>, %arg1: memref<3x16xf32, #tpu.memory_space<vmem>>, %arg2: memref<5x32xf32, #tpu.memory_space<vmem>>, %arg3: memref<16x32xf32, #tpu.memory_space<vmem>>) attributes {dimension_semantics = [], scalar_prefetch = 0 : i64, scratch_operands = 0 : i64, tpu.core_type = #tpu.core_type<tc>} {
    %c0 = arith.constant 0 : index
    %c0_0 = arith.constant 0 : index
    %0 = vector.load %arg0[%c0, %c0_0] : memref<16x8xf32, #tpu.memory_space<vmem>>, vector<16x8xf32>
    %1 = vector.extract_strided_slice %0 {offsets = [0, 0], sizes = [16, 3], strides = [1, 1]} : vector<16x8xf32> to vector<16x3xf32>
    %cst = arith.constant 2.000000e+00 : f32
    %2 = vector.broadcast %cst : f32 to vector<16x3xf32>
    %3 = arith.mulf %2, %1 : vector<16x3xf32>
    %cst_1 = arith.constant 1.000000e+00 : f32
    %4 = vector.broadcast %cst_1 : f32 to vector<16x3xf32>
    %5 = arith.subf %3, %4 : vector<16x3xf32>
    %c0_2 = arith.constant 0 : index
    %c0_3 = arith.constant 0 : index
    %6 = vector.load %arg1[%c0_2, %c0_3] : memref<3x16xf32, #tpu.memory_space<vmem>>, vector<3x16xf32>
    %7 = vector.extract_strided_slice %5 {offsets = [0, 0], sizes = [16, 1], strides = [1, 1]} : vector<16x3xf32> to vector<16x1xf32>
    %8 = vector.extract_strided_slice %6 {offsets = [0, 0], sizes = [1, 16], strides = [1, 1]} : vector<3x16xf32> to vector<1x16xf32>
    %9 = vector.broadcast %7 : vector<16x1xf32> to vector<16x16xf32>
    %10 = vector.broadcast %8 : vector<1x16xf32> to vector<16x16xf32>
    %11 = arith.mulf %9, %10 : vector<16x16xf32>
    %12 = vector.extract_strided_slice %5 {offsets = [0, 1], sizes = [16, 1], strides = [1, 1]} : vector<16x3xf32> to vector<16x1xf32>
    %13 = vector.extract_strided_slice %6 {offsets = [1, 0], sizes = [1, 16], strides = [1, 1]} : vector<3x16xf32> to vector<1x16xf32>
    %14 = vector.broadcast %12 : vector<16x1xf32> to vector<16x16xf32>
    %15 = vector.broadcast %13 : vector<1x16xf32> to vector<16x16xf32>
    %16 = arith.mulf %14, %15 : vector<16x16xf32>
    %17 = arith.addf %11, %16 : vector<16x16xf32>
    %18 = vector.extract_strided_slice %5 {offsets = [0, 2], sizes = [16, 1], strides = [1, 1]} : vector<16x3xf32> to vector<16x1xf32>
    %19 = vector.extract_strided_slice %6 {offsets = [2, 0], sizes = [1, 16], strides = [1, 1]} : vector<3x16xf32> to vector<1x16xf32>
    %20 = vector.broadcast %18 : vector<16x1xf32> to vector<16x16xf32>
    %21 = vector.broadcast %19 : vector<1x16xf32> to vector<16x16xf32>
    %22 = arith.mulf %20, %21 : vector<16x16xf32>
    %23 = arith.addf %17, %22 : vector<16x16xf32>
    %cst_4 = arith.constant 6.28318548 : f32
    %24 = vector.broadcast %cst_4 : f32 to vector<16x16xf32>
    %25 = arith.mulf %24, %23 : vector<16x16xf32>
    %26 = vector.extract_strided_slice %0 {offsets = [0, 3], sizes = [16, 1], strides = [1, 1]} : vector<16x8xf32> to vector<16x1xf32>
    %c0_5 = arith.constant 0 : index
    %c0_6 = arith.constant 0 : index
    %27 = vector.load %arg2[%c0_5, %c0_6] : memref<5x32xf32, #tpu.memory_space<vmem>>, vector<5x32xf32>
    %cst_7 = arith.constant -1.000000e+00 : f32
    %28 = vector.broadcast %cst_7 : f32 to vector<16x1xf32>
    %29 = arith.cmpf oeq, %26, %28 : vector<16x1xf32>
    %cst_8 = arith.constant 1.000000e+00 : f32
    %cst_9 = arith.constant 0.000000e+00 : f32
    %30 = vector.broadcast %cst_8 : f32 to vector<16x1xf32>
    %31 = vector.broadcast %cst_9 : f32 to vector<16x1xf32>
    %32 = arith.select %29, %30, %31 : vector<16x1xi1>, vector<16x1xf32>
    %33 = vector.extract_strided_slice %27 {offsets = [0, 0], sizes = [1, 32], strides = [1, 1]} : vector<5x32xf32> to vector<1x32xf32>
    %34 = vector.broadcast %32 : vector<16x1xf32> to vector<16x32xf32>
    %35 = vector.broadcast %33 : vector<1x32xf32> to vector<16x32xf32>
    %36 = arith.mulf %34, %35 : vector<16x32xf32>
    %cst_10 = arith.constant 0.000000e+00 : f32
    %37 = vector.broadcast %cst_10 : f32 to vector<16x1xf32>
    %38 = arith.cmpf oeq, %26, %37 : vector<16x1xf32>
    %cst_11 = arith.constant 1.000000e+00 : f32
    %cst_12 = arith.constant 0.000000e+00 : f32
    %39 = vector.broadcast %cst_11 : f32 to vector<16x1xf32>
    %40 = vector.broadcast %cst_12 : f32 to vector<16x1xf32>
    %41 = arith.select %38, %39, %40 : vector<16x1xi1>, vector<16x1xf32>
    %42 = vector.extract_strided_slice %27 {offsets = [1, 0], sizes = [1, 32], strides = [1, 1]} : vector<5x32xf32> to vector<1x32xf32>
    %43 = vector.broadcast %41 : vector<16x1xf32> to vector<16x32xf32>
    %44 = vector.broadcast %42 : vector<1x32xf32> to vector<16x32xf32>
    %45 = arith.mulf %43, %44 : vector<16x32xf32>
    %46 = arith.addf %36, %45 : vector<16x32xf32>
    %cst_13 = arith.constant 1.000000e+00 : f32
    %47 = vector.broadcast %cst_13 : f32 to vector<16x1xf32>
    %48 = arith.cmpf oeq, %26, %47 : vector<16x1xf32>
    %cst_14 = arith.constant 1.000000e+00 : f32
    %cst_15 = arith.constant 0.000000e+00 : f32
    %49 = vector.broadcast %cst_14 : f32 to vector<16x1xf32>
    %50 = vector.broadcast %cst_15 : f32 to vector<16x1xf32>
    %51 = arith.select %48, %49, %50 : vector<16x1xi1>, vector<16x1xf32>
    %52 = vector.extract_strided_slice %27 {offsets = [2, 0], sizes = [1, 32], strides = [1, 1]} : vector<5x32xf32> to vector<1x32xf32>
    %53 = vector.broadcast %51 : vector<16x1xf32> to vector<16x32xf32>
    %54 = vector.broadcast %52 : vector<1x32xf32> to vector<16x32xf32>
    %55 = arith.mulf %53, %54 : vector<16x32xf32>
    %56 = arith.addf %46, %55 : vector<16x32xf32>
    %cst_16 = arith.constant 2.000000e+00 : f32
    %57 = vector.broadcast %cst_16 : f32 to vector<16x1xf32>
    %58 = arith.cmpf oeq, %26, %57 : vector<16x1xf32>
    %cst_17 = arith.constant 1.000000e+00 : f32
    %cst_18 = arith.constant 0.000000e+00 : f32
    %59 = vector.broadcast %cst_17 : f32 to vector<16x1xf32>
    %60 = vector.broadcast %cst_18 : f32 to vector<16x1xf32>
    %61 = arith.select %58, %59, %60 : vector<16x1xi1>, vector<16x1xf32>
    %62 = vector.extract_strided_slice %27 {offsets = [3, 0], sizes = [1, 32], strides = [1, 1]} : vector<5x32xf32> to vector<1x32xf32>
    %63 = vector.broadcast %61 : vector<16x1xf32> to vector<16x32xf32>
    %64 = vector.broadcast %62 : vector<1x32xf32> to vector<16x32xf32>
    %65 = arith.mulf %63, %64 : vector<16x32xf32>
    %66 = arith.addf %56, %65 : vector<16x32xf32>
    %cst_19 = arith.constant 3.000000e+00 : f32
    %67 = vector.broadcast %cst_19 : f32 to vector<16x1xf32>
    %68 = arith.cmpf oeq, %26, %67 : vector<16x1xf32>
    %cst_20 = arith.constant 1.000000e+00 : f32
    %cst_21 = arith.constant 0.000000e+00 : f32
    %69 = vector.broadcast %cst_20 : f32 to vector<16x1xf32>
    %70 = vector.broadcast %cst_21 : f32 to vector<16x1xf32>
    %71 = arith.select %68, %69, %70 : vector<16x1xi1>, vector<16x1xf32>
    %72 = vector.extract_strided_slice %27 {offsets = [4, 0], sizes = [1, 32], strides = [1, 1]} : vector<5x32xf32> to vector<1x32xf32>
    %73 = vector.broadcast %71 : vector<16x1xf32> to vector<16x32xf32>
    %74 = vector.broadcast %72 : vector<1x32xf32> to vector<16x32xf32>
    %75 = arith.mulf %73, %74 : vector<16x32xf32>
    %76 = arith.addf %66, %75 : vector<16x32xf32>
    %cst_22 = arith.constant -1.000000e+00 : f32
    %77 = vector.broadcast %cst_22 : f32 to vector<16x1xf32>
    %78 = arith.cmpf oeq, %26, %77 : vector<16x1xf32>
    %cst_23 = arith.constant 1.000000e+00 : f32
    %cst_24 = arith.constant 0.000000e+00 : f32
    %79 = vector.broadcast %cst_23 : f32 to vector<16x1xf32>
    %80 = vector.broadcast %cst_24 : f32 to vector<16x1xf32>
    %81 = arith.select %78, %79, %80 : vector<16x1xi1>, vector<16x1xf32>
    %cst_25 = arith.constant 1.000000e+00 : f32
    %82 = vector.broadcast %cst_25 : f32 to vector<16x1xf32>
    %83 = arith.subf %82, %81 : vector<16x1xf32>
    %84 = math.sin %25 : vector<16x16xf32>
    %85 = vector.broadcast %83 : vector<16x1xf32> to vector<16x16xf32>
    %86 = arith.mulf %85, %84 : vector<16x16xf32>
    %87 = vector.extract_strided_slice %76 {offsets = [0, 0], sizes = [16, 16], strides = [1, 1]} : vector<16x32xf32> to vector<16x16xf32>
    %88 = arith.addf %86, %87 : vector<16x16xf32>
    %c0_26 = arith.constant 0 : index
    %c0_27 = arith.constant 0 : index
    %89 = vector.load %arg3[%c0_26, %c0_27] : memref<16x32xf32, #tpu.memory_space<vmem>>, vector<16x16xf32>
    tpu.vector_store %arg3[%c0_26, %c0_27], %88 {strides = array<i32>} : memref<16x32xf32, #tpu.memory_space<vmem>>, vector<16x16xf32>,
    %90 = math.cos %25 : vector<16x16xf32>
    %91 = vector.broadcast %83 : vector<16x1xf32> to vector<16x16xf32>
    %92 = arith.mulf %91, %90 : vector<16x16xf32>
    %93 = vector.extract_strided_slice %76 {offsets = [0, 16], sizes = [16, 16], strides = [1, 1]} : vector<16x32xf32> to vector<16x16xf32>
    %94 = arith.addf %92, %93 : vector<16x16xf32>
    %c0_28 = arith.constant 0 : index
    %c16 = arith.constant 16 : index
    %95 = vector.load %arg3[%c0_28, %c16] : memref<16x32xf32, #tpu.memory_space<vmem>>, vector<16x16xf32>
    tpu.vector_store %arg3[%c0_28, %c16], %94 {strides = array<i32>} : memref<16x32xf32, #tpu.memory_space<vmem>>, vector<16x16xf32>,
    return
  }
}

</mosaic_0001>

<bundles_post_ra>
// kernel: tpu_custom_call.1
= control target key start
LH: loop header
LB: loop body
LE: loop exit
PB: predicated region body
PF: predicated region fallthrough
CT: control target
= control target key end

     0   :  { %v756_v2 = vmov 1   ;;  %v757_v3 = vmov 0   ;;  %s920_s0 = inlined_call_operand.vmem [shape: f32[16,8], index: 0, kind: input, shape index: {}]   ;;  %s921_s1 = inlined_call_operand.vmem [shape: f32[3,16], index: 1, kind: input, shape index: {}]   ;;  %s922_s2 = inlined_call_operand.vmem [shape: f32[5,32], index: 2, kind: input, shape index: {}]   ;;  %s923_s3 = inlined_call_operand.hbm [shape: f32[16,32], index: 3, kind: output, shape index: {}]  }
   0x1   :  { %v15_v0 = vld [vmem:[%s920_s0] sm:$0xff]  ;;  %v16_v1 = vld [vmem:[%s920_s0 + $0x8] sm:$0xff]  ;;  %696 = vset.pattern.permute.xlu1 %v756_v2  ;;  %695 = vset.pattern.permute.xlu0 %v757_v3 }
   0x2   :  { %v17_v4 = vmul.f32 2.0, %v15_v0  ;;  %v18_v5 = vmul.f32 2.0, %v16_v1 }
   0x3   :  { %8 = vsyncpa [#allocation3], 0  ;;  %vm73_vm0 = vcmp.eq.f32.partialorder %v15_v0, -1.0  ;;  %vm74_vm1 = vcmp.eq.f32.partialorder %v16_v1, -1.0  ;;  %vm93_vm2 = vcmp.eq.f32.partialorder %v15_v0, 0.0  ;;  %vm94_vm3 = vcmp.eq.f32.partialorder %v16_v1, 0.0 }
   0x4   :  { %v653_v6 = vadd.f32 -1.0, %v17_v4  ;;  %v654_v7 = vadd.f32 -1.0, %v18_v5  ;;  %v758_v8 = vmov 0.0   ;;  %v759_v13 = vmov 2   ;;  %v21_v32 = vld [vmem:[%s921_s1] sm:$0x7] }
   0x5   :  { %v75_v9 = vsel %vm73_vm0, 1.0, %v758_v8  ;;  %v76_v10 = vsel %vm74_vm1, 1.0, %v758_v8  ;;  %v95_v11 = vsel %vm93_vm2, 1.0, %v758_v8  ;;  %v96_v12 = vsel %vm94_vm3, 1.0, %v758_v8  ;;  %v72_v51 = vld [vmem:[%s922_s2] sm:$0x1f] }
   0x6   :  { %39 = vperm.xlu1 %696, %v653_v6   ;;  %24 = vperm.xlu0 %695, %v653_v6   ;;  %vm115_vm4 = vcmp.eq.f32.partialorder %v15_v0, 1.0  ;;  %vm116_vm5 = vcmp.eq.f32.partialorder %v16_v1, 1.0  ;;  %vm159_vm6 = vcmp.eq.f32.partialorder %v15_v0, 3.0  ;;  %vm160_vm7 = vcmp.eq.f32.partialorder %v16_v1, 3.0  ;;  %s767_s2 = smov 112   ;;  %s768_s18 = smov 16  }
   0x7   :  { %v700_v14 = vpack.i.bf16 %v76_v10, %v75_v9  ;;  %v706_v15 = vpack.i.bf16 %v96_v12, %v95_v11  ;;  %v117_v16 = vsel %vm115_vm4, 1.0, %v758_v8  ;;  %v118_v17 = vsel %vm116_vm5, 1.0, %v758_v8  ;;  %s769_s19 = smov [#allocation2]  }
   0x8   :  { %v161_v18 = vsel %vm159_vm6, 1.0, %v758_v8  ;;  %v162_v19 = vsel %vm160_vm7, 1.0, %v758_v8  ;;  %vm137_vm8 = vcmp.eq.f32.partialorder %v15_v0, 2.0  ;;  %vm138_vm9 = vcmp.eq.f32.partialorder %v16_v1, 2.0  ;;  %s642_s20 = sshll.u32 %s769_s19, 4  ;;  %s643_s20 = int_to_ptr.vmem [resolvable:$true] %s642_s20 }
   0x9   :  { %v760_v20 = vmov 3   ;;  %v711_v21 = vpack.i.bf16 %v118_v17, %v117_v16  ;;  %v721_v22 = vpack.i.bf16 %v162_v19, %v161_v18  ;;  %v139_v23 = vsel %vm137_vm8, 1.0, %v758_v8  ;;  %s734_s21 = scalar_lea.vmem %s643_s20, 256  ;;  %p739_p1 = scmp.lt.s32.totalorder %s643_s20, %s643_s20 }
   0xa   :  { %43 = vperm.xlu1 %696, %v654_v7   ;;  %29 = vperm.xlu0 %695, %v654_v7   ;;  %v140_v24 = vsel %vm138_vm9, 1.0, %v758_v8  ;;  %v182_v26 = vsub.f32 1.0, %v76_v10  ;;  %v181_v27 = vsub.f32 1.0, %v75_v9  ;;  %v32_v28 = vlaneseq  ;;  %p735_p0 = scmp.ne.s32.totalorder %s643_s20, %s734_s21  ;;  %p740_p2 = scmp.lt.s32.totalorder %s734_s21, %s734_s21 }
   0xb   :  { %v716_v25 = vpack.i.bf16 %v140_v24, %v139_v23 }
   0xc   :  { %v33_v29 = vshrl.u32 %v32_v28, 7  ;;  %p741_p3 = por %p740_p2, %p739_p1 }
   0xe   :  { %698 = vset.pattern.permute.xlu1 %v759_v13  ;;  %697 = vset.pattern.permute.xlu0 %v759_v13  ;;  %v48_v30 = vsub.s32 1, %v33_v29  ;;  %v34_v31 = vsub.s32 0, %v33_v29  ;;  %v64_v35 = vsub.s32 2, %v33_v29  ;;  %v175_v60 = vsub.s32 4, %v33_v29  ;;  %p742_p4 = pnand %p741_p3, %p735_p0 }
   0xf   :  { %59 = vperm.xlu1 %698, %v654_v7   ;;  %55 = vperm.xlu0 %697, %v653_v6   ;;  %v153_v61 = vsub.s32 3, %v33_v29 }
  0x10   :  { %v49_v36 = vrot.slane %v21_v32, %v48_v30  ;;  %v35_v37 = vrot.slane %v21_v32, %v34_v31  ;;  %v65_v40 = vrot.slane %v21_v32, %v64_v35  ;;  %v90_v54 = vrot.slane %v72_v51, %v34_v31 }
  0x11   :  { %v110_v55 = vrot.slane %v72_v51, %v48_v30  ;;  %v132_v7 = vrot.slane %v72_v51, %v64_v35  ;;  %v176_v11 = vrot.slane %v72_v51, %v175_v60  ;;  %v154_v12 = vrot.slane %v72_v51, %v153_v61 }
  0x13   :  { %699 = vset.pattern.permute.xlu1 %v760_v20  ;;  %705 = vset.pattern.permute.xlu0 %v760_v20 }
  0x14   :  { %701 = vperm.xlu1 %699, %v700_v14   ;;  %707 = vperm.xlu0 %705, %v706_v15  }
  0x18   :  { %712 = vperm.xlu1 %699, %v711_v21   ;;  %722 = vperm.xlu0 %705, %v721_v22  }
  0x1c   :  { %717 = vperm.xlu1 %699, %v716_v25   ;;  %398 = vperm.xlu0 %705, %v182_v26  }
  0x20   :  { %393 = vperm.xlu1 %699, %v181_v27  }
  0x81   :  { %v40_v33 = vpop.permute.xlu1 %39  ;;  %v25_v34 = vpop.permute.xlu0 %24 }
  0x82   :  { %v50_v41 = vmul.f32 %v49_v36, %v40_v33  ;;  %v36_v42 = vmul.f32 %v35_v37, %v25_v34 }
  0x84   :  { %v52_v47 = vadd.f32 %v50_v41, %v36_v42 }
  0x85   :  { %v44_v38 = vpop.permute.xlu1 %43  ;;  %v30_v39 = vpop.permute.xlu0 %29 }
  0x86   :  { %v51_v43 = vmul.f32 %v49_v36, %v44_v38  ;;  %v37_v44 = vmul.f32 %v35_v37, %v30_v39 }
  0x88   :  { %v53_v48 = vadd.f32 %v51_v43, %v37_v44 }
  0x8a   :  { %v60_v45 = vpop.permute.xlu1 %59  ;;  %v56_v46 = vpop.permute.xlu0 %55 }
  0x8b   :  { %v67_v49 = vmul.f32 %v65_v40, %v60_v45  ;;  %v66_v50 = vmul.f32 %v65_v40, %v56_v46 }
  0x8d   :  { %v69_v52 = vadd.f32 %v67_v49, %v53_v48  ;;  %v68_v53 = vadd.f32 %v66_v50, %v52_v47  ;;  %v761_v50 = vmov 2102212464  }
  0x8f   :  { %v804_v56 = vmul.f32 6.2831855, %v69_v52  ;;  %v806_v57 = vmul.f32 6.2831855, %v68_v53  ;;  %v702_v58 = vpop.permute.xlu1 %701  ;;  %v708_v59 = vpop.permute.xlu0 %707  ;;  %v762_v52 = vmov 920167782  }
  0x90   :  { %v704_v62 = vunpack.i.h.bf16 %v702_v58  ;;  %v703_v63 = vunpack.i.l.bf16 %v702_v58  ;;  %v709_v0 = vunpack.i.l.bf16 %v708_v59  ;;  %v710_v3 = vunpack.i.h.bf16 %v708_v59 }
  0x91   :  { %v290_v1 = vand.u32 2139095040, %v804_v56  ;;  %v186_v2 = vand.u32 2139095040, %v806_v57  ;;  %v287_v4 = vand.u32 2147483647, %v804_v56  ;;  %v183_v49 = vand.u32 2147483647, %v806_v57 }
  0x92   :  { %v91_v5 = vmul.f32 %v703_v63, %v90_v54  ;;  %v111_v6 = vmul.f32 %v709_v0, %v110_v55  ;;  %v92_v19 = vmul.f32 %v704_v62, %v90_v54  ;;  %v112_v20 = vmul.f32 %v710_v3, %v110_v55 }
  0x93   :  { %v291_v8 = vshrl.u32 %v290_v1, 23  ;;  %v187_v9 = vshrl.u32 %v186_v2, 23  ;;  %v713_v10 = vpop.permute.xlu1 %712  ;;  %v723_v15 = vpop.permute.xlu0 %722  ;;  %v294_v16 = vand.u32 8388607, %v287_v4  ;;  %v763_v58 = vmov 1326507024  }
  0x94   :  { %v715_v13 = vunpack.i.h.bf16 %v713_v10  ;;  %v714_v14 = vunpack.i.l.bf16 %v713_v10  ;;  %v113_v21 = vadd.f32 %v111_v6, %v91_v5  ;;  %v725_v26 = vunpack.i.h.bf16 %v723_v15 }
  0x95   :  { %v659_v17 = vadd.s32 4294967169, %v291_v8  ;;  %v655_v18 = vadd.s32 4294967169, %v187_v9  ;;  %v724_v28 = vunpack.i.l.bf16 %v723_v15  ;;  %v295_v31 = vor.u32 8388608, %v294_v16 }
  0x96   :  { %v133_v22 = vmul.f32 %v714_v14, %v132_v7  ;;  %v134_v25 = vmul.f32 %v715_v13, %v132_v7  ;;  %v114_v32 = vadd.f32 %v112_v20, %v92_v19  ;;  %v178_v43 = vmul.f32 %v725_v26, %v176_v11 }
  0x97   :  { %v297_v23 = vadd.s32 1, %v659_v17  ;;  %v193_v24 = vadd.s32 1, %v655_v18  ;;  %v718_v27 = vpop.permute.xlu1 %717  ;;  %v177_v44 = vmul.f32 %v724_v28, %v176_v11  ;;  %v819_v45 = vshll.u32 %v295_v31, 8 }
  0x98   :  { %v720_v29 = vunpack.i.h.bf16 %v718_v27  ;;  %v719_v30 = vunpack.i.l.bf16 %v718_v27  ;;  %v135_v33 = vadd.f32 %v133_v22, %v113_v21  ;;  %v136_v41 = vadd.f32 %v134_v25, %v114_v32 }
  0x99   :  { %vm298_vm10 = vcmp.gt.s32.totalorder %v297_v23, 0  ;;  %vm194_vm11 = vcmp.gt.s32.totalorder %v193_v24, 0  ;;  %v764_v0 = vmov 683565275   ;;  %v765_v2 = vmov 2475754826  }
  0x9a   :  { %v299_v34 = vsel %vm298_vm10, %v297_v23, 0  ;;  %v195_v35 = vsel %vm194_vm11, %v193_v24, 0  ;;  %v156_v36 = vmul.f32 %v720_v29, %v154_v12  ;;  %v155_v37 = vmul.f32 %v719_v30, %v154_v12 }
  0x9b   :  { %v813_v38 = vshrl.u32 %v299_v34, 5  ;;  %v301_v39 = vand.u32 31, %v299_v34  ;;  %v815_v40 = vand.u32 31, %v195_v35  ;;  %v817_v42 = vshrl.u32 %v195_v35, 5 }
  0x9c   :  { %v157_v47 = vadd.f32 %v155_v37, %v135_v33  ;;  %v158_v48 = vadd.f32 %v156_v36, %v136_v41  ;;  %v766_v8 = vmov 2131351028   ;;  %v190_v34 = vand.u32 8388607, %v183_v49 }
  0x9d   :  { %v302_v46 = vsub.s32 32, %v301_v39  ;;  %v313_v51 = vshll.u32 %v761_v50, %v301_v39  ;;  %v316_v53 = vshll.u32 %v762_v52, %v301_v39  ;;  %vm322_vm12 = vcmp.lt.s32.totalorder %v813_v38, 4 }
  0x9e   :  { %v198_v54 = vsub.s32 32, %v815_v40  ;;  %v209_v60 = vshll.u32 %v761_v50, %v815_v40  ;;  %v212_v61 = vshll.u32 %v762_v52, %v815_v40  ;;  %vm218_vm13 = vcmp.lt.s32.totalorder %v817_v42, 4 }
  0x9f   :  { %v314_v55 = vshrl.u32 %v762_v52, %v302_v46  ;;  %v317_v59 = vshrl.u32 %v763_v58, %v302_v46  ;;  %v304_v1 = vshll.u32 %v764_v0, %v301_v39  ;;  %v305_v3 = vshrl.u32 %v765_v2, %v302_v46 }
  0xa0   :  { %v210_v62 = vshrl.u32 %v762_v52, %v198_v54  ;;  %v213_v63 = vshrl.u32 %v763_v58, %v198_v54  ;;  %v307_v7 = vshll.u32 %v765_v2, %v301_v39  ;;  %v308_v9 = vshrl.u32 %v766_v8, %v302_v46 }
  0xa1   :  { %v315_v5 = vor.u32 %v314_v55, %v313_v51  ;;  %v318_v6 = vor.u32 %v317_v59, %v316_v53  ;;  %v303_v10 = vshrl.u32 %v764_v0, %v302_v46  ;;  %v306_v11 = vor.u32 %v305_v3, %v304_v1 }
  0xa2   :  { %v310_v12 = vshll.u32 %v766_v8, %v301_v39  ;;  %v311_v13 = vshrl.u32 %v761_v50, %v302_v46  ;;  %v211_v16 = vor.u32 %v210_v62, %v209_v60  ;;  %v309_v17 = vor.u32 %v308_v9, %v307_v7 }
  0xa3   :  { %v328_v14 = vsel %vm322_vm12, %v315_v5, 920167782  ;;  %v332_v15 = vsel %vm322_vm12, %v318_v6, 1326507024  ;;  %v214_v18 = vor.u32 %v213_v63, %v212_v61  ;;  %vm319_vm14 = vcmp.lt.s32.totalorder %v813_v38, 1 }
  0xa4   :  { %v312_v19 = vor.u32 %v311_v13, %v310_v12  ;;  %vm320_vm15 = vcmp.lt.s32.totalorder %v813_v38, 2  ;;  %vm321_vm0 = vcmp.lt.s32.totalorder %v813_v38, 3  ;;  %v323_v20 = vsel %vm319_vm14, %v303_v10, %v306_v11 }
  0xa5   :  { %v327_v21 = vsel %vm319_vm14, %v306_v11, %v309_v17  ;;  %v837_v22 = vadd.f32 %v178_v43, %v158_v48  ;;  %v333_v26 = vsel %vm321_vm0, %v315_v5, %v332_v15  ;;  %v841_v30 = vadd.f32 %v177_v44, %v157_v47 }
  0xa6   :  { %v324_v23 = vsel %vm322_vm12, %v312_v19, 2102212464  ;;  %v329_v24 = vsel %vm321_vm0, %v312_v19, %v328_v14  ;;  %v331_v25 = vsel %vm319_vm14, %v309_v17, %v312_v19  ;;  %v224_v35 = vsel %vm218_vm13, %v211_v16, 920167782 }
  0xa7   :  { %v325_v27 = vsel %vm321_vm0, %v309_v17, %v324_v23  ;;  %v330_v28 = vsel %vm320_vm15, %v327_v21, %v329_v24  ;;  %v334_v29 = vsel %vm320_vm15, %v331_v25, %v333_v26  ;;  %620 = vrot.lane.b32.xlu0 %v837_v22, %s767_s2  ;;  %v228_v36 = vsel %vm218_vm13, %v214_v18, 1326507024  ;;  %618 = vrot.lane.b32.xlu1 %v841_v30, %s767_s2 }
  0xa8   :  { %v326_v31 = vsel %vm320_vm15, %v323_v20, %v325_v27  ;;  %v845_v32 = vmul.u32.u64.low %v819_v45, %v334_v29  ;;  %v846_v33 = vmul.u32.u64.high %v819_v45, %v334_v29, %v845_v32  ;;  %v191_v41 = vor.u32 8388608, %v190_v34 }
  0xa9   :  { %v855_v37 = vmul.u32.u64.low %v819_v45, %v330_v28  ;;  %v856_v38 = vmul.u32.u64.high %v819_v45, %v330_v28, %v855_v37  ;;  %v342_v39 = vmul.u32 %v819_v45, %v326_v31  ;;  %v200_v43 = vshll.u32 %v764_v0, %v815_v40 }
  0xaa   :  { %v201_v44 = vshrl.u32 %v765_v2, %v198_v54  ;;  %v203_v46 = vshll.u32 %v765_v2, %v815_v40  ;;  %v204_v47 = vshrl.u32 %v766_v8, %v198_v54  ;;  %v206_v48 = vshll.u32 %v766_v8, %v815_v40 }
  0xab   :  { %v207_v51 = vshrl.u32 %v761_v50, %v198_v54  ;;  %vm344_vm1 = vc.u32 %v846_v33, %v855_v37  ;;  %v199_v52 = vshrl.u32 %v764_v0, %v198_v54  ;;  %vm215_vm2 = vcmp.lt.s32.totalorder %v817_v42, 1 }
  0xac   :  { %v202_v53 = vor.u32 %v201_v44, %v200_v43  ;;  %v345_v55 = vadd.s32 1, %v856_v38  ;;  %v205_v45 = vor.u32 %v204_v47, %v203_v46  ;;  %vm217_vm3 = vcmp.lt.s32.totalorder %v817_v42, 3 }
  0xad   :  { %v208_v58 = vor.u32 %v207_v51, %v206_v48  ;;  %vm216_vm4 = vcmp.lt.s32.totalorder %v817_v42, 2  ;;  %v229_v40 = vsel %vm217_vm3, %v211_v16, %v228_v36  ;;  %v231_v60 = vshll.u32 %v191_v41, 8 }
  0xae   :  { %v219_v59 = vsel %vm215_vm2, %v199_v52, %v202_v53  ;;  %v346_v50 = vsel %vm344_vm1, %v345_v55, %v856_v38  ;;  %v223_v61 = vsel %vm215_vm2, %v202_v53, %v205_v45  ;;  %v343_v28 = vadd.s32 %v855_v37, %v846_v33 }
  0xaf   :  { %v220_v54 = vsel %vm218_vm13, %v208_v58, 2102212464  ;;  %v225_v62 = vsel %vm217_vm3, %v208_v58, %v224_v35  ;;  %v347_v63 = vadd.s32 %v346_v50, %v342_v39  ;;  %v227_v2 = vsel %vm215_vm2, %v205_v45, %v208_v58 }
  0xb0   :  { %v221_v0 = vsel %vm217_vm3, %v205_v45, %v220_v54  ;;  %v226_v1 = vsel %vm216_vm4, %v223_v61, %v225_v62  ;;  %v230_v3 = vsel %vm216_vm4, %v227_v2, %v229_v40  ;;  %vm289_vm8 = vcmp.lt.s32.totalorder %v804_v56, 0 }
  0xb1   :  { %v882_v5 = vmul.u32.u64.low %v231_v60, %v226_v1  ;;  %v883_v6 = vmul.u32.u64.high %v231_v60, %v226_v1, %v882_v5  ;;  %v348_v7 = vadd.s32 536870912, %v347_v63  ;;  %v222_v10 = vsel %vm216_vm4, %v219_v59, %v221_v0 }
  0xb2   :  { %v885_v8 = vmul.u32.u64.low %v231_v60, %v230_v3  ;;  %v886_v9 = vmul.u32.u64.high %v231_v60, %v230_v3, %v885_v8  ;;  %v238_v14 = vmul.u32 %v231_v60, %v222_v10  ;;  %vm288_vm9 = vcmp.le.f32.partialorder %v287_v4, 0.7853982 }
  0xb3   :  { %v349_v11 = vshrl.u32 %v348_v7, 30  ;;  %v241_v12 = vadd.s32 1, %v883_v6  ;;  %vm185_vm10 = vcmp.lt.s32.totalorder %v806_v57, 0  ;;  %vm184_vm11 = vcmp.le.f32.partialorder %v183_v49, 0.7853982 }
  0xb4   :  { %vm240_vm5 = vc.u32 %v886_v9, %v882_v5  ;;  %v239_v51 = vadd.s32 %v882_v5, %v886_v9  ;;  %vm379_vm15 = vweird.f32 %v804_v56  ;;  %vm405_vm0 = vcmask 130048  }
  0xb5   :  { %v350_v13 = vshll.u32 %v349_v11, 30  ;;  %v242_v15 = vsel %vm240_vm5, %v241_v12, %v883_v6  ;;  %v373_v59 = vsub.s32 4, %v349_v11  ;;  %vm275_vm4 = vweird.f32 %v806_v57 }
  0xb6   :  { %v243_v17 = vadd.s32 %v242_v15, %v238_v14 }
  0xb7   :  { %v351_v16 = vsub.s32 %v347_v63, %v350_v13  ;;  %v374_v62 = vsel %vm289_vm8, %v373_v59, %v349_v11 }
  0xb8   :  { %v244_v19 = vadd.s32 536870912, %v243_v17  ;;  %v376_v2 = vsel %vm288_vm9, 0, %v374_v62 }
  0xb9   :  { %v353_v18 = vsub.s32 0, %v351_v16  ;;  %v380_v6 = vadd.s32 3, %v376_v2 }
  0xba   :  { %v245_v21 = vshrl.u32 %v244_v19, 30  ;;  %v399_v19 = vpop.permute.xlu0 %398 }
  0xbb   :  { %v660_v20 = vmin.u32 %v353_v18, %v351_v16  ;;  %v381_v9 = vand.u32 3, %v380_v6 }
  0xbc   :  { %v246_v24 = vshll.u32 %v245_v21, 30  ;;  %v269_v5 = vsub.s32 4, %v245_v21 }
  0xbd   :  { %v355_v23 = vclz %v660_v20  ;;  %vm386_vm12 = vcmp.eq.s32.totalorder %v381_v9, 2  ;;  %vm383_vm13 = vcmp.eq.s32.totalorder %v381_v9, 0  ;;  %vm382_vm14 = vcmp.lt.s32.totalorder %v381_v9, 2 }
  0xbe   :  { %v247_v42 = vsub.s32 %v243_v17, %v246_v24  ;;  %v270_v8 = vsel %vm185_vm10, %v269_v5, %v245_v21 }
  0xbf   :  { %v661_v25 = vadd.s32 4294967294, %v355_v23  ;;  %v272_v11 = vsel %vm184_vm11, 0, %v270_v8 }
  0xc0   :  { %v249_v27 = vsub.s32 0, %v247_v42 }
  0xc1   :  { %vm662_vm6 = vcmp.lt.s32.totalorder %v661_v25, 0 }
  0xc2   :  { %v358_v26 = vsel %vm662_vm6, 0, %v661_v25  ;;  %v656_v32 = vmin.u32 %v249_v27, %v247_v42 }
  0xc3   :  { %v359_v29 = vsub.s32 32, %v358_v26  ;;  %v363_v31 = vsub.s32 4294967266, %v358_v26  ;;  %v360_v34 = vshll.u32 %v351_v16, %v358_v26  ;;  %v276_v16 = vadd.s32 3, %v272_v11 }
  0xc4   :  { %v251_v38 = vclz %v656_v32 }
  0xc5   :  { %v361_v35 = vshrl.u32 %v343_v28, %v359_v29  ;;  %v364_v36 = vadd.s32 127, %v363_v31  ;;  %v277_v21 = vand.u32 3, %v276_v16  ;;  %v394_v31 = vpop.permute.xlu1 %393 }
  0xc6   :  { %v657_v43 = vadd.s32 4294967294, %v251_v38 }
  0xc7   :  { %v362_v39 = vor.u32 %v361_v35, %v360_v34  ;;  %v365_v41 = vshll.u32 %v364_v36, 23  ;;  %vm282_vm1 = vcmp.eq.s32.totalorder %v277_v21, 2  ;;  %vm279_vm2 = vcmp.eq.s32.totalorder %v277_v21, 0 }
  0xc8   :  { %vm658_vm7 = vcmp.lt.s32.totalorder %v657_v43, 0  ;;  %vm278_vm3 = vcmp.lt.s32.totalorder %v277_v21, 2  ;;  %v604_v35 = vand.u32 3, %v376_v2  ;;  %v501_v36 = vand.u32 3, %v272_v11 }
  0xc9   :  { %v366_v44 = vor.u32 4788187, %v365_v41  ;;  %v369_v47 = vcvt.s32.f32 %v362_v39  ;;  %v254_v48 = vsel %vm658_vm7, 0, %v657_v43 }
  0xca   :  { %v255_v52 = vsub.s32 32, %v254_v48  ;;  %v259_v53 = vsub.s32 4294967266, %v254_v48  ;;  %v256_v37 = vshll.u32 %v247_v42, %v254_v48  ;;  %vm606_vm5 = vcmp.eq.s32.totalorder %v604_v35, 0 }
  0xcb   :  { %v367_v46 = vand.u32 2147483647, %v366_v44  ;;  %vm609_vm6 = vcmp.eq.s32.totalorder %v604_v35, 2  ;;  %vm503_vm7 = vcmp.eq.s32.totalorder %v501_v36, 0 }
  0xcc   :  { %v257_v55 = vshrl.u32 %v239_v51, %v255_v52  ;;  %v260_v45 = vadd.s32 127, %v259_v53 }
  0xcd   :  { %v370_v33 = vmul.f32 %v369_v47, %v367_v46 }
  0xce   :  { %v258_v40 = vor.u32 %v257_v55, %v256_v37  ;;  %v261_v60 = vshll.u32 %v260_v45, 23 }
  0xcf   :  { %v371_v58 = vxor.u32 2147483648, %v370_v33 }
  0xd0   :  { %v262_v61 = vor.u32 4788187, %v261_v60  ;;  %v265_v0 = vcvt.s32.f32 %v258_v40 }
  0xd1   :  { %v372_v50 = vsel %vm289_vm8, %v371_v58, %v370_v33  ;;  %vm506_vm8 = vcmp.eq.s32.totalorder %v501_v36, 2 }
  0xd2   :  { %v375_v54 = vsel %vm288_vm9, %v804_v56, %v372_v50  ;;  %v263_v63 = vand.u32 2147483647, %v262_v61  ;;  %vm605_vm9 = vcmp.lt.s32.totalorder %v604_v35, 2 }
  0xd3   :  { %726 = vcosq.f32 %v375_v54 }
  0xd4   :  { %728 = vsinq.f32 %v375_v54  ;;  %v266_v1 = vmul.f32 %v265_v0, %v263_v63 }
  0xd6   :  { %v267_v3 = vxor.u32 2147483648, %v266_v1 }
  0xd8   :  { %v268_v4 = vsel %vm185_vm10, %v267_v3, %v266_v1  ;;  %vm502_vm10 = vcmp.lt.s32.totalorder %v501_v36, 2 }
  0xd9   :  { %v271_v7 = vsel %vm184_vm11, %v806_v57, %v268_v4  ;;  %vm634_vm11 = vcmask 261248  }
  0xda   :  { %730 = vcosq.f32 %v271_v7 }
  0xdb   :  { %732 = vsinq.f32 %v271_v7 }
  0xe0   :  { %v727_v10 = vpop.eup %726 }
  0xe1   :  { %v729_v12 = vpop.eup %728  ;;  %v387_v13 = vxor.u32 2147483648, %v727_v10 }
  0xe2   :  { %v384_v14 = vxor.u32 2147483648, %v729_v12 }
  0xe3   :  { %v388_v15 = vsel %vm386_vm12, %v387_v13, %v729_v12  ;;  %v611_v39 = vsel %vm609_vm6, %v387_v13, %v729_v12 }
  0xe4   :  { %v385_v17 = vsel %vm383_vm13, %v727_v10, %v384_v14  ;;  %v608_v38 = vsel %vm606_vm5, %v727_v10, %v384_v14 }
  0xe5   :  { %v389_v49 = vsel %vm382_vm14, %v385_v17, %v388_v15  ;;  %v612_v44 = vsel %vm605_vm9, %v608_v38, %v611_v39 }
  0xe6   :  { %v390_v18 = vsel %vm379_vm15, nan, %v389_v49  ;;  %v613_v47 = vsel %vm379_vm15, nan, %v612_v44 }
  0xe7   :  { %v402_v20 = vmul.f32 %v399_v19, %v390_v18  ;;  %v731_v23 = vpop.eup %730  ;;  %v615_v48 = vmul.f32 %v613_v47, %v399_v19 }
  0xe8   :  { %v733_v25 = vpop.eup %732  ;;  %v283_v42 = vxor.u32 2147483648, %v731_v23 }
  0xe9   :  { %v404_v24 = vadd.f32 %v402_v20, %v837_v22  ;;  %v280_v26 = vxor.u32 2147483648, %v733_v25 }
  0xea   :  { %v284_v27 = vsel %vm282_vm1, %v283_v42, %v733_v25  ;;  %v508_v43 = vsel %vm506_vm8, %v283_v42, %v733_v25 }
  0xeb   :  { %407 = vst.msk [vmem:[#allocation2 + $0x8] sm:$0xff] %vm405_vm0, %v404_v24  ;;  %v281_v28 = vsel %vm279_vm2, %v731_v23, %v280_v26  ;;  %v505_v41 = vsel %vm503_vm7, %v731_v23, %v280_v26 }
  0xec   :  { %v285_v29 = vsel %vm278_vm3, %v281_v28, %v284_v27  ;;  %v509_v46 = vsel %vm502_vm10, %v505_v41, %v508_v43 }
  0xed   :  { %v286_v32 = vsel %vm275_vm4, nan, %v285_v29 }
  0xee   :  { %v401_v34 = vmul.f32 %v394_v31, %v286_v32 }
  0xf0   :  { %v403_v22 = vadd.f32 %v401_v34, %v841_v30  ;;  %v510_v30 = vsel %vm275_vm4, nan, %v509_v46 }
  0xf1   :  { %v614_v52 = vmul.f32 %v510_v30, %v394_v31 }
  0xf2   :  { %406 = vst.msk [vmem:[#allocation2] sm:$0xff] %vm405_vm0, %v403_v22 }
 0x119   :  { %v621_v51 = vpop.permute.xlu0 %620  ;;  %v619_v33 = vpop.permute.xlu1 %618 }
 0x11a   :  { %v625_v53 = vadd.f32 %v621_v51, %v615_v48  ;;  %v624_v37 = vadd.f32 %v619_v33, %v614_v52 }
 0x11c   :  { %630 = vrot.lane.b32.xlu0 %v625_v53, %s768_s18  ;;  %628 = vrot.lane.b32.xlu1 %v624_v37, %s768_s18 }
 0x18e   :  { %v631_v55 = vpop.permute.xlu0 %630  ;;  %v629_v56 = vpop.permute.xlu1 %628 }
 0x18f   :  { %636 = vst.msk [vmem:[#allocation2 + $0x8] sm:$0xff] %vm634_vm11, %v631_v55  ;;  %635 = vst.msk [vmem:[#allocation2] sm:$0xff] %vm634_vm11, %v629_v56 }
 0x190   :  { %745 = shalt.err (!%p742_p4)
}
 0x191   :  { %s770_s22 = smov 128   ;;  %s771_s23 = smov 8  }
 0x192   :  { %648 = dma.vmem_to_hbm [thread:$0]  %s643_s20, 256, %s923_s3, [#allocation3], %s770_s22, %s770_s22, %s771_s23  }
 0x193   :  { %754 = dma.done.wait [#allocation3], 256  }
 0x194   :  { %755 = vsyncadd [#allocation3], 4294967040 }
 0x195   :  { %652 = vsyncpa [#allocation3], 1 }

</bundles_post_ra>
